<compile_context>
chip_gen: v6e
topology: v6e:2x2x1
jax: 0.10.0
libtpu: 0.0.40
codegen_flags: <defaults>
</compile_context>

<pallas_src>
import jax
import jax.numpy as jnp
from jax.experimental import pallas as pl
from jax.experimental.pallas import tpu as pltpu

_LANE = 128


def _round_up(x, m):
    return (x + m - 1) // m * m


def _make_mean_kernel(num_samples, tg, chunk):
    """Kernel over one (TG, S, E) input block -> (TG, E) output block."""
    denom = float(num_samples)
    n_chunks = tg // chunk
    assert n_chunks * chunk == tg

    def kernel(h_ref, out_ref):
        if n_chunks == 1:
            # Small block: one straight-line f32 reduce over the sample axis.
            x = h_ref[...].astype(jnp.float32)
            out_ref[...] = (jnp.sum(x, axis=1) / denom).astype(out_ref.dtype)
        else:
            # Large block: bound the live f32 working set by reducing / storing
            # `chunk` groups at a time (keeps vreg pressure low; the whole loop
            # still hides under the next block's input DMA).
            def body(c, carry):
                g0 = pl.multiple_of(c * chunk, chunk)
                x = h_ref[pl.ds(g0, chunk), :, :].astype(jnp.float32)
                out_ref[pl.ds(g0, chunk), :] = (
                    jnp.sum(x, axis=1) / denom
                ).astype(out_ref.dtype)
                return carry

            jax.lax.fori_loop(0, n_chunks, body, 0)

    return kernel


def mean_averaging(h, *, emb_dim, num_samples, groups_per_step=None,
                   block_budget_bytes=8 * 1024 * 1024):
    """Pallas implementation of MeanAveraging.forward."""
    assert h.ndim == 2
    h = h.reshape(-1, emb_dim)
    rows = h.shape[0]
    assert rows % num_samples == 0, "rows must be divisible by num_samples"
    g = rows // num_samples
    # Wrapper-side reshape is metadata only; gives the kernel a clean 3-D view.
    h3 = h.reshape(g, num_samples, emb_dim)

    itemsize = jnp.dtype(h3.dtype).itemsize
    sub = max(8, 32 // itemsize)          # sublane multiple: f32->8, bf16->16, int8->32
    # PADDED VMEM footprint of one group's (S, E) slab — what a block really costs.
    padded_group_bytes = (
        _round_up(num_samples, sub) * _round_up(emb_dim, _LANE) * itemsize
    )
    padded_total_bytes = g * padded_group_bytes

    if groups_per_step is None:
        budget_tg = max(1, block_budget_bytes // padded_group_bytes)
        if padded_total_bytes <= (2 << 20):
            # Tiny input: a single grid step; step overhead is negligible.
            tg = g
        elif g >= 16:
            # Force >= 2 grid steps so (a) input/output DMA overlaps the reduce
            # on every chip and (b) the "parallel" axis can shard across v7x's
            # two TensorCores.
            tg = min(budget_tg, g // 2)
            if tg >= 128:
                tg = (tg // 128) * 128     # keeps the in-kernel chunk loop even
            else:
                tg = max(8, (tg // 8) * 8)
        elif g > 8:
            tg = 8                          # 2+ steps even for a handful of big groups
        else:
            tg = g                          # few groups: output block must equal G
    else:
        tg = int(groups_per_step)
    assert tg == g or tg % 8 == 0, (
        "group tile must be 8-aligned (sublane-dense output rows) or the full extent"
    )

    padded_in_block = tg * padded_group_bytes
    padded_out_block = _round_up(tg, 8) * _round_up(emb_dim, _LANE) * itemsize
    assert padded_in_block <= (20 << 20), (
        f"one input block needs {padded_in_block} padded VMEM bytes; "
        "reduce groups_per_step / block_budget_bytes (or split along the "
        "sample axis — see TODO)."
    )

    # Explicit scoped-VMEM limit: 2x double-buffered in + 2x out + headroom.
    vmem_limit = 2 * padded_in_block + 2 * padded_out_block + (4 << 20)
    vmem_limit = int(min(max(vmem_limit, 16 << 20), 64 << 20))

    # In-kernel reduction chunk along the group axis (bounds vreg pressure).
    if tg >= 128 and tg % 128 == 0:
        chunk = 128
    else:
        chunk = tg

    grid = (pl.cdiv(g, tg),)

    return pl.pallas_call(
        _make_mean_kernel(num_samples, tg, chunk),
        out_shape=jax.ShapeDtypeStruct((g, emb_dim), h3.dtype),
        grid_spec=pltpu.PrefetchScalarGridSpec(
            num_scalar_prefetch=0,
            grid=grid,
            in_specs=[
                # (TG, S, E): last two dims equal the full array dims -> always legal.
                pl.BlockSpec((tg, num_samples, emb_dim), lambda i: (i, 0, 0)),
            ],
            out_specs=pl.BlockSpec((tg, emb_dim), lambda i: (i, 0)),
        ),
        compiler_params=pltpu.CompilerParams(
            # Group tiles are independent -> shardable across v7x's two TensorCores.
            dimension_semantics=("parallel",),
            vmem_limit_bytes=vmem_limit,
        ),
        cost_estimate=pl.CostEstimate(
            flops=2 * g * num_samples * emb_dim,
            transcendentals=0,
            bytes_accessed=h3.size * itemsize + g * emb_dim * itemsize,
        ),
    )(h3)


if __name__ == "__main__":
    key = jax.random.PRNGKey(0)
    k1, k2 = jax.random.split(key)

    # Case 1: f32, sublane-aligned sample count; single-tile and tiled paths.
    emb_dim, num_samples, num_groups = 32, 8, 16          # h: [128, 32]
    h = jax.random.normal(k1, (num_groups * num_samples, emb_dim), dtype=jnp.float32)

    out_single = jax.block_until_ready(
        mean_averaging(h, emb_dim=emb_dim, num_samples=num_samples))
    out_tiled = jax.block_until_ready(
        mean_averaging(h, emb_dim=emb_dim, num_samples=num_samples, groups_per_step=8))

    ref = h.reshape(num_groups, num_samples, emb_dim).mean(axis=1)
    assert out_single.shape == (num_groups, emb_dim)
    assert out_tiled.shape == (num_groups, emb_dim)
    assert jnp.allclose(out_single, ref, atol=1e-5, rtol=1e-5), "mismatch (single tile)"
    assert jnp.allclose(out_tiled, ref, atol=1e-5, rtol=1e-5), "mismatch (tiled grid)"

    # Case 2: bf16 with a non-sublane-aligned sample count (exercises the
    # padding-aware budget path and f32 accumulation).
    emb_dim2, num_samples2, num_groups2 = 32, 10, 8        # h2: [80, 32]
    h2 = jax.random.normal(
        k2, (num_groups2 * num_samples2, emb_dim2), dtype=jnp.float32
    ).astype(jnp.bfloat16)
    out2 = jax.block_until_ready(
        mean_averaging(h2, emb_dim=emb_dim2, num_samples=num_samples2))
    ref2 = (
        h2.astype(jnp.float32)
        .reshape(num_groups2, num_samples2, emb_dim2)
        .mean(axis=1)
    )
    assert out2.shape == (num_groups2, emb_dim2)
    assert jnp.allclose(out2.astype(jnp.float32), ref2, atol=2e-2, rtol=2e-2), \
        "mismatch (bf16)"

    print("KERNEL_OK")
</pallas_src>

<mosaic_0001>
module attributes {stable_mosaic.version = 11 : i64} {
  func.func @kernel(%arg0: i32, %arg1: memref<16x8x32xf32, #tpu.memory_space<vmem>>, %arg2: memref<16x32xf32, #tpu.memory_space<vmem>>) attributes {dimension_semantics = [#tpu.dimension_semantics<parallel>], iteration_bounds = array<i64: 1>, scalar_prefetch = 0 : i64, scratch_operands = 0 : i64, tpu.core_type = #tpu.core_type<tc>, window_params = [{transform_indices = @transform_0, window_bounds = array<i64: 16, 8, 32>}, {transform_indices = @transform_1, window_bounds = array<i64: 16, 32>}]} {
    %c0 = arith.constant 0 : index
    %c0_0 = arith.constant 0 : index
    %c0_1 = arith.constant 0 : index
    %0 = vector.load %arg1[%c0, %c0_0, %c0_1] : memref<16x8x32xf32, #tpu.memory_space<vmem>>, vector<16x8x32xf32>
    %cst = arith.constant dense<0.000000e+00> : vector<16x32xf32>
    %1 = vector.multi_reduction <add>, %0, %cst [1] : vector<16x8x32xf32> to vector<16x32xf32>
    %cst_2 = arith.constant 8.000000e+00 : f32
    %2 = vector.broadcast %cst_2 : f32 to vector<16x32xf32>
    %3 = arith.divf %1, %2 : vector<16x32xf32>
    %c0_3 = arith.constant 0 : index
    %c0_4 = arith.constant 0 : index
    %4 = vector.load %arg2[%c0_3, %c0_4] : memref<16x32xf32, #tpu.memory_space<vmem>>, vector<16x32xf32>
    tpu.vector_store %arg2[%c0_3, %c0_4], %3 {strides = array<i32>} : memref<16x32xf32, #tpu.memory_space<vmem>>, vector<16x32xf32>,
    return
  }
  func.func @transform_0(%arg0: i32) -> (i32, i32, i32) {
    %c0_i32 = arith.constant 0 : i32
    %c0_i32_0 = arith.constant 0 : i32
    %c0_i32_1 = arith.constant 0 : i32
    return %arg0, %c0_i32, %c0_i32_0 : i32, i32, i32
  }
  func.func @transform_1(%arg0: i32) -> (i32, i32) {
    %c0_i32 = arith.constant 0 : i32
    %c0_i32_0 = arith.constant 0 : i32
    return %arg0, %c0_i32 : i32, i32
  }
}

</mosaic_0001>

<bundles_post_ra>
// kernel: tpu_custom_call.1
= control target key start
LH: loop header
LB: loop body
LE: loop exit
PB: predicated region body
PF: predicated region fallthrough
CT: control target
= control target key end

     0   :  { %6 = vsyncpa [#allocation3], 0  ;;  %s333_s0 = inlined_call_operand.hbm [shape: f32[16,8,32], index: 0, kind: input, shape index: {}]   ;;  %s334_s1 = inlined_call_operand.hbm [shape: f32[16,32], index: 1, kind: output, shape index: {}]  }
   0x1   :  { %7 = vsyncpa [#allocation4], 0  ;;  %s275_s6 = smov [#allocation2]  }
   0x2   :  { %s13_s7 = sshll.u32 %s275_s6, 4  ;;  %s14_s7 = int_to_ptr.vmem [resolvable:$true] %s13_s7 }
   0x3   :  { %s239_s8 = scalar_lea.vmem %s14_s7, 2048  ;;  %p244_p1 = scmp.lt.s32.totalorder %s14_s7, %s14_s7 }
   0x4   :  { %p240_p0 = scmp.ne.s32.totalorder %s14_s7, %s239_s8  ;;  %p245_p2 = scmp.lt.s32.totalorder %s239_s8, %s239_s8 }
   0x6   :  { %p246_p3 = por %p245_p2, %p244_p1 }
   0x8   :  { %p247_p4 = pnand %p246_p3, %p240_p0 }
   0xa   :  { %250 = shalt.err (!%p247_p4)
}
   0xb   :  { %s276_s9 = smov 128   ;;  %s277_s10 = smov 8  }
   0xc   :  { %19 = dma.hbm_to_vmem [thread:$0]  %s333_s0, 2048, %s14_s7, [#allocation3], %s276_s9, %s276_s9, %s277_s10  }
   0xd   :  { %271 = dma.done.wait [#allocation3], 2048  }
   0xe   :  { %272 = vsyncadd [#allocation3], 4294965248  ;;  %vm39_vm0 = vcmask 261120   ;;  %v23_v0 = vld [vmem:[#allocation2] sm:$0xff]  ;;  %v24_v1 = vld [vmem:[#allocation2 + $0x8] sm:$0xff]  ;;  %vm185_vm1 = vcmask 1041409  }
   0xf   :  { %v25_v2 = vld [vmem:[#allocation2 + $0x10] sm:$0xff]  ;;  %v26_v3 = vld [vmem:[#allocation2 + $0x18] sm:$0xff]  ;;  %v27_v4 = vld [vmem:[#allocation2 + $0x20] sm:$0xff]  ;;  %v40_v6 = vsel %vm39_vm0, %v23_v0, 0.0  ;;  %v47_v7 = vsel %vm39_vm0, %v24_v1, 0.0  ;;  %vm187_vm2 = vcmask 1042434  }
  0x10   :  { %v28_v5 = vld [vmem:[#allocation2 + $0x28] sm:$0xff]  ;;  %v54_v8 = vsel %vm39_vm0, %v25_v2, 0.0  ;;  %v29_v9 = vld [vmem:[#allocation2 + $0x30] sm:$0xff]  ;;  %v30_v10 = vld [vmem:[#allocation2 + $0x38] sm:$0xff]  ;;  %v41_v11 = vrot.slane %v40_v6, 4  ;;  %v48_v12 = vrot.slane %v47_v7, 4 }
  0x11   :  { %v55_v13 = vrot.slane %v54_v8, 4  ;;  %v61_v14 = vsel %vm39_vm0, %v26_v3, 0.0  ;;  %v68_v16 = vsel %vm39_vm0, %v27_v4, 0.0  ;;  %v75_v17 = vsel %vm39_vm0, %v28_v5, 0.0  ;;  %v31_v59 = vld [vmem:[#allocation2 + $0x40] sm:$0xff]  ;;  %v32_v60 = vld [vmem:[#allocation2 + $0x48] sm:$0xff] }
  0x12   :  { %v62_v15 = vrot.slane %v61_v14, 4  ;;  %v82_v18 = vsel %vm39_vm0, %v29_v9, 0.0  ;;  %v42_v19 = vadd.f32 %v41_v11, %v40_v6  ;;  %v49_v20 = vadd.f32 %v48_v12, %v47_v7  ;;  %v33_v5 = vld [vmem:[#allocation2 + $0x50] sm:$0xff]  ;;  %s278_s0 = smov [#allocation5]  }
  0x13   :  { %v56_v21 = vadd.f32 %v55_v13, %v54_v8  ;;  %v69_v22 = vrot.slane %v68_v16, 4  ;;  %v76_v24 = vrot.slane %v75_v17, 4  ;;  %v83_v25 = vrot.slane %v82_v18, 4  ;;  %v34_v8 = vld [vmem:[#allocation2 + $0x58] sm:$0xff]  ;;  %s215_s13 = sshll.u32 %s278_s0, 4  ;;  %s216_s13 = int_to_ptr.vmem [resolvable:$true] %s215_s13 }
  0x14   :  { %v63_v23 = vadd.f32 %v62_v15, %v61_v14  ;;  %v89_v26 = vsel %vm39_vm0, %v30_v10, 0.0  ;;  %v43_v27 = vrot.slane %v42_v19, 2  ;;  %v50_v28 = vrot.slane %v49_v20, 2  ;;  %s251_s14 = scalar_lea.vmem %s216_s13, 256  ;;  %p256_p6 = scmp.lt.s32.totalorder %s216_s13, %s216_s13 }
  0x15   :  { %v57_v29 = vrot.slane %v56_v21, 2  ;;  %v70_v30 = vadd.f32 %v69_v22, %v68_v16  ;;  %v77_v32 = vadd.f32 %v76_v24, %v75_v17  ;;  %v84_v33 = vadd.f32 %v83_v25, %v82_v18  ;;  %v35_v16 = vld [vmem:[#allocation2 + $0x60] sm:$0xff]  ;;  %v36_v17 = vld [vmem:[#allocation2 + $0x68] sm:$0xff]  ;;  %p252_p5 = scmp.ne.s32.totalorder %s216_s13, %s251_s14  ;;  %p257_p7 = scmp.lt.s32.totalorder %s251_s14, %s251_s14 }
  0x16   :  { %v64_v31 = vrot.slane %v63_v23, 2  ;;  %v90_v34 = vrot.slane %v89_v26, 4  ;;  %vm189_vm3 = vcmask 1043459   ;;  %v44_v35 = vadd.f32 %v43_v27, %v42_v19 }
  0x17   :  { %v51_v36 = vadd.f32 %v50_v28, %v49_v20  ;;  %v58_v37 = vadd.f32 %v57_v29, %v56_v21  ;;  %v71_v38 = vrot.slane %v70_v30, 2  ;;  %vm191_vm4 = vcmask 1044484   ;;  %p258_p8 = por %p257_p7, %p256_p6 }
  0x18   :  { %v65_v39 = vadd.f32 %v64_v31, %v63_v23  ;;  %v78_v40 = vrot.slane %v77_v32, 2  ;;  %v85_v41 = vrot.slane %v84_v33, 2  ;;  %v91_v42 = vadd.f32 %v90_v34, %v89_v26  ;;  %v37_v26 = vld [vmem:[#allocation2 + $0x70] sm:$0xff] }
  0x19   :  { %vm193_vm5 = vcmask 1045509   ;;  %v45_v43 = vrot.slane %v44_v35, 1  ;;  %v52_v44 = vrot.slane %v51_v36, 1  ;;  %v59_v45 = vrot.slane %v58_v37, 1  ;;  %p259_p9 = pnand %p258_p8, %p252_p5 }
  0x1a   :  { %v72_v46 = vadd.f32 %v71_v38, %v70_v30  ;;  %vm195_vm6 = vcmask 1046534   ;;  %v66_v47 = vrot.slane %v65_v39, 1  ;;  %v79_v48 = vadd.f32 %v78_v40, %v77_v32 }
  0x1b   :  { %v86_v49 = vadd.f32 %v85_v41, %v84_v33  ;;  %v92_v50 = vrot.slane %v91_v42, 2  ;;  %vm197_vm7 = vcmask 1047559   ;;  %v46_v51 = vadd.f32 %v45_v43, %v44_v35  ;;  %v38_v35 = vld [vmem:[#allocation2 + $0x78] sm:$0xff] }
  0x1c   :  { %v53_v52 = vadd.f32 %v52_v44, %v51_v36  ;;  %v60_v53 = vadd.f32 %v59_v45, %v58_v37  ;;  %v73_v54 = vrot.slane %v72_v46, 1  ;;  %v67_v55 = vadd.f32 %v66_v47, %v65_v39 }
  0x1d   :  { %v80_v56 = vrot.slane %v79_v48, 1  ;;  %v87_v57 = vrot.slane %v86_v49, 1  ;;  %v93_v58 = vadd.f32 %v92_v50, %v91_v42  ;;  %v153_v62 = vmul.f32 0.125, %v46_v51 }
  0x1e   :  { %v74_v61 = vadd.f32 %v73_v54, %v72_v46  ;;  %v154_v63 = vmul.f32 0.125, %v53_v52  ;;  %v155_v0 = vmul.f32 0.125, %v60_v53  ;;  %v156_v4 = vmul.f32 0.125, %v67_v55 }
  0x1f   :  { %v81_v1 = vadd.f32 %v80_v56, %v79_v48  ;;  %v88_v2 = vadd.f32 %v87_v57, %v86_v49  ;;  %v94_v3 = vrot.slane %v93_v58, 1  ;;  %v96_v9 = vsel %vm39_vm0, %v31_v59, 0.0 }
  0x20   :  { %v157_v6 = vmul.f32 0.125, %v74_v61  ;;  %v186_v7 = vsel %vm185_vm1, %v154_v63, %v153_v62  ;;  %v103_v10 = vsel %vm39_vm0, %v32_v60, 0.0  ;;  %v97_v18 = vrot.slane %v96_v9, 4 }
  0x21   :  { %v95_v11 = vadd.f32 %v94_v3, %v93_v58  ;;  %v158_v12 = vmul.f32 0.125, %v81_v1  ;;  %v159_v13 = vmul.f32 0.125, %v88_v2  ;;  %v188_v14 = vsel %vm187_vm2, %v155_v0, %v186_v7 }
  0x22   :  { %v190_v15 = vsel %vm189_vm3, %v156_v4, %v188_v14  ;;  %v104_v19 = vrot.slane %v103_v10, 4  ;;  %v110_v20 = vsel %vm39_vm0, %v33_v5, 0.0  ;;  %v117_v24 = vsel %vm39_vm0, %v34_v8, 0.0 }
  0x23   :  { %v160_v21 = vmul.f32 0.125, %v95_v11  ;;  %v192_v22 = vsel %vm191_vm4, %v157_v6, %v190_v15  ;;  %v111_v23 = vrot.slane %v110_v20, 4  ;;  %v98_v27 = vadd.f32 %v97_v18, %v96_v9 }
  0x24   :  { %v194_v25 = vsel %vm193_vm5, %v158_v12, %v192_v22  ;;  %v105_v28 = vadd.f32 %v104_v19, %v103_v10  ;;  %v118_v29 = vrot.slane %v117_v24, 4  ;;  %v124_v32 = vsel %vm39_vm0, %v35_v16, 0.0 }
  0x25   :  { %v196_v30 = vsel %vm195_vm6, %v159_v13, %v194_v25  ;;  %v112_v31 = vadd.f32 %v111_v23, %v110_v20  ;;  %v131_v33 = vsel %vm39_vm0, %v36_v17, 0.0  ;;  %v99_v36 = vrot.slane %v98_v27, 2 }
  0x26   :  { %v198_v34 = vsel %vm197_vm7, %v160_v21, %v196_v30  ;;  %v106_v37 = vrot.slane %v105_v28, 2  ;;  %v119_v38 = vadd.f32 %v118_v29, %v117_v24  ;;  %v125_v40 = vrot.slane %v124_v32, 4 }
  0x27   :  { %208 = vst.msk [vmem:[#allocation5] sm:$0xff] %vm39_vm0, %v198_v34  ;;  %v113_v39 = vrot.slane %v112_v31, 2  ;;  %v132_v41 = vrot.slane %v131_v33, 4  ;;  %v138_v42 = vsel %vm39_vm0, %v37_v26, 0.0  ;;  %v100_v43 = vadd.f32 %v99_v36, %v98_v27 }
  0x28   :  { %v107_v44 = vadd.f32 %v106_v37, %v105_v28  ;;  %v120_v45 = vrot.slane %v119_v38, 2  ;;  %v139_v46 = vrot.slane %v138_v42, 4  ;;  %v126_v48 = vadd.f32 %v125_v40, %v124_v32 }
  0x29   :  { %v114_v47 = vadd.f32 %v113_v39, %v112_v31  ;;  %v133_v49 = vadd.f32 %v132_v41, %v131_v33  ;;  %v145_v50 = vsel %vm39_vm0, %v38_v35, 0.0  ;;  %v101_v51 = vrot.slane %v100_v43, 1 }
  0x2a   :  { %v108_v52 = vrot.slane %v107_v44, 1  ;;  %v121_v53 = vadd.f32 %v120_v45, %v119_v38  ;;  %v140_v54 = vadd.f32 %v139_v46, %v138_v42  ;;  %v127_v56 = vrot.slane %v126_v48, 2 }
  0x2b   :  { %v115_v55 = vrot.slane %v114_v47, 1  ;;  %v134_v57 = vrot.slane %v133_v49, 2  ;;  %v146_v58 = vrot.slane %v145_v50, 4  ;;  %v102_v59 = vadd.f32 %v101_v51, %v100_v43 }
  0x2c   :  { %v109_v60 = vadd.f32 %v108_v52, %v107_v44  ;;  %v122_v61 = vrot.slane %v121_v53, 1  ;;  %v141_v62 = vrot.slane %v140_v54, 2  ;;  %v128_v0 = vadd.f32 %v127_v56, %v126_v48 }
  0x2d   :  { %v116_v63 = vadd.f32 %v115_v55, %v114_v47  ;;  %v135_v1 = vadd.f32 %v134_v57, %v133_v49  ;;  %v147_v2 = vadd.f32 %v146_v58, %v145_v50  ;;  %v161_v5 = vmul.f32 0.125, %v102_v59 }
  0x2e   :  { %v123_v3 = vadd.f32 %v122_v61, %v121_v53  ;;  %v142_v4 = vadd.f32 %v141_v62, %v140_v54  ;;  %v162_v6 = vmul.f32 0.125, %v109_v60  ;;  %v129_v7 = vrot.slane %v128_v0, 1 }
  0x2f   :  { %v136_v8 = vrot.slane %v135_v1, 1  ;;  %v148_v9 = vrot.slane %v147_v2, 2  ;;  %v163_v10 = vmul.f32 0.125, %v116_v63 }
  0x30   :  { %v143_v11 = vrot.slane %v142_v4, 1  ;;  %v164_v12 = vmul.f32 0.125, %v123_v3  ;;  %v199_v13 = vsel %vm185_vm1, %v162_v6, %v161_v5  ;;  %v130_v14 = vadd.f32 %v129_v7, %v128_v0 }
  0x31   :  { %v137_v15 = vadd.f32 %v136_v8, %v135_v1  ;;  %v149_v16 = vadd.f32 %v148_v9, %v147_v2  ;;  %v200_v17 = vsel %vm187_vm2, %v163_v10, %v199_v13 }
  0x32   :  { %v144_v18 = vadd.f32 %v143_v11, %v142_v4  ;;  %v201_v19 = vsel %vm189_vm3, %v164_v12, %v200_v17  ;;  %v165_v21 = vmul.f32 0.125, %v130_v14 }
  0x33   :  { %v150_v20 = vrot.slane %v149_v16, 1  ;;  %v166_v22 = vmul.f32 0.125, %v137_v15 }
  0x34   :  { %v167_v23 = vmul.f32 0.125, %v144_v18  ;;  %v202_v25 = vsel %vm191_vm4, %v165_v21, %v201_v19 }
  0x35   :  { %v151_v24 = vadd.f32 %v150_v20, %v149_v16  ;;  %v203_v26 = vsel %vm193_vm5, %v166_v22, %v202_v25 }
  0x36   :  { %v204_v28 = vsel %vm195_vm6, %v167_v23, %v203_v26 }
  0x37   :  { %v168_v27 = vmul.f32 0.125, %v151_v24 }
  0x39   :  { %v205_v29 = vsel %vm197_vm7, %v168_v27, %v204_v28 }
  0x3a   :  { %209 = vst.msk [vmem:[#allocation5 + $0x8] sm:$0xff] %vm39_vm0, %v205_v29 }
  0x3b   :  { %262 = shalt.err (!%p259_p9)
}
  0x3c   :  { %221 = dma.vmem_to_hbm [thread:$0]  %s216_s13, 256, %s334_s1, [#allocation4], %s276_s9, %s276_s9, %s277_s10  }
  0x3d   :  { %273 = dma.done.wait [#allocation4], 256  }
  0x3e   :  { %274 = vsyncadd [#allocation4], 4294967040 }
  0x3f   :  { %225 = vsyncpa [#allocation3], 1 }
  0x40   :  { %226 = vsyncpa [#allocation4], 1 }

</bundles_post_ra>
